<compile_context>
chip_gen: v5e
topology: v5e:2x2
jax: 0.10.0
libtpu: 0.0.40
codegen_flags: <defaults>
</compile_context>

<pallas_src>
import jax
import jax.numpy as jnp
import numpy as np
from jax.experimental import pallas as pl
from jax.experimental.pallas import tpu as pltpu


# ---------------------------------------------------------------------------
# Host-side helpers: bilinear resize matrices, crop offset, VMEM sizing.
# ---------------------------------------------------------------------------
def _bilinear_resize_matrix(in_size: int, out_size: int) -> np.ndarray:
    """R[out, in] such that (R @ x) == torch bilinear resize (antialias=False,
    align_corners=False / half-pixel centers) along one axis."""
    scale = in_size / out_size
    i = np.arange(out_size, dtype=np.float64)
    src = (i + 0.5) * scale - 0.5
    src = np.maximum(src, 0.0)               # torch clamps negative source coords
    x0 = np.floor(src)
    w1 = src - x0
    x0 = np.minimum(x0, in_size - 1).astype(np.int64)
    x1 = np.minimum(x0 + 1, in_size - 1)
    w0 = 1.0 - w1
    R = np.zeros((out_size, in_size), dtype=np.float64)
    np.add.at(R, (np.arange(out_size), x0), w0)
    np.add.at(R, (np.arange(out_size), x1), w1)
    return R


def _center_crop_offset(full: int, crop: int) -> int:
    # torchvision F.center_crop convention
    return int(round((full - crop) / 2.0))


def _vmem_ceiling_bytes() -> int:
    """Physical VMEM minus headroom; conservative fallback if the query fails."""
    try:
        cap = int(pltpu.get_tpu_info().vmem_capacity_bytes)
    except Exception:
        cap = 64 << 20        # v7x has the smallest physical VMEM per TensorCore
    return max(cap - (12 << 20), 16 << 20)


def _const_block_spec(block_shape):
    """BlockSpec for a grid-invariant operand (constant index_map).

    Single-buffered when supported: the block never changes across grid steps,
    so a second pipeline buffer would only burn VMEM.
    """
    index_map = lambda b, sc, bi: (0, 0)
    try:
        return pl.BlockSpec(block_shape, index_map, pipeline_mode=pl.Buffered(1))
    except Exception:          # older jax without pipeline_mode / Buffered
        return pl.BlockSpec(block_shape, index_map)


# ---------------------------------------------------------------------------
# Pallas kernel: one image (C, H, W) per grid step -> (C, crop, crop) output.
# ---------------------------------------------------------------------------
def _make_preprocess_kernel(mxu_dtype):
    def kernel(scale_ref, bias_ref, rh_ref, rwT_ref, x_ref, o_ref):
        # scale_ref/bias_ref: SMEM (C,) f32 -> per-channel 1/std and -mean/std
        # rh_ref : (crop, H)   mxu_dtype  (center crop + optional 1/255 folded in)
        # rwT_ref: (W, crop)   mxu_dtype  (pre-transposed on the host)
        # x_ref  : (C, H, W)   f32 or u8  (one full image per grid step)
        # o_ref  : (C, crop, crop) f32
        C, H, W = x_ref.shape

        # ---- Step 1: single merged MXU matmul along W for all channels. ----
        # (C, H, W) -> (C*H, W) merges the two leading (sublane-major) dims and
        # never touches the lane dim, so the reshape is layout-cheap.
        x = x_ref[...].astype(jnp.float32).astype(mxu_dtype)
        y = jnp.dot(x.reshape(C * H, W), rwT_ref[...],
                    preferred_element_type=jnp.float32)           # (C*H, crop)
        y = y.astype(mxu_dtype)

        # ---- Step 2: small per-channel Rh matmul + fused normalize epilogue.
        rh = rh_ref[...]
        for c in range(C):                        # static unroll; C is tiny
            res = jnp.dot(rh, y[c * H:(c + 1) * H],
                          preferred_element_type=jnp.float32)     # (crop, crop)
            o_ref[c] = res * scale_ref[c] + bias_ref[c]

    return kernel


def image_classification_preprocess(
    img: jax.Array,
    *,
    crop_size: int,
    resize_size: int = 256,
    mean=(0.485, 0.456, 0.406),
    std=(0.229, 0.224, 0.225),
    mxu_dtype=jnp.bfloat16,
):
    """Pallas TPU implementation of torchvision ImageClassification.forward.

    img: (B, C, H, W) float32 in [0, 1] or uint8.  Assumes H == W (square).
    """
    B, C, H, W = img.shape
    assert H == W, "square images assumed (single-int resize_size semantics)"
    assert resize_size >= crop_size, "resize_size < crop_size (padding) unsupported"
    assert len(mean) == C and len(std) == C

    # Resize matrices with the center crop (and uint8 1/255) folded in.
    top = _center_crop_offset(resize_size, crop_size)
    left = _center_crop_offset(resize_size, crop_size)
    Rh = _bilinear_resize_matrix(H, resize_size)[top:top + crop_size, :]    # (crop, H)
    Rw = _bilinear_resize_matrix(W, resize_size)[left:left + crop_size, :]  # (crop, W)
    if img.dtype == jnp.uint8:
        Rh = Rh / 255.0                     # convert_image_dtype(uint8 -> float)
    Rh = jnp.asarray(Rh, dtype=mxu_dtype)                                   # (crop, H)
    RwT = jnp.asarray(Rw.T, dtype=mxu_dtype)                                # (W, crop)

    mean_np = np.asarray(mean, dtype=np.float64)
    std_np = np.asarray(std, dtype=np.float64)
    scale_arr = jnp.asarray(1.0 / std_np, dtype=jnp.float32)                # (C,)
    bias_arr = jnp.asarray(-mean_np / std_np, dtype=jnp.float32)            # (C,)

    grid_spec = pltpu.PrefetchScalarGridSpec(
        num_scalar_prefetch=2,                        # scale, bias -> SMEM
        grid=(B,),
        in_specs=[
            _const_block_spec((crop_size, H)),                              # Rh
            _const_block_spec((W, crop_size)),                              # RwT
            pl.BlockSpec((None, C, H, W), lambda b, sc, bi: (b, 0, 0, 0)),  # img
        ],
        out_specs=pl.BlockSpec(
            (None, C, crop_size, crop_size), lambda b, sc, bi: (b, 0, 0, 0)),
    )

    # Advisory cost estimate for XLA scheduling around this call.
    mxu_bytes = jnp.dtype(mxu_dtype).itemsize
    flops = B * C * (2 * H * W * crop_size + 2 * H * crop_size * crop_size)
    bytes_accessed = (
        int(img.size) * img.dtype.itemsize
        + B * C * crop_size * crop_size * 4
        + (crop_size * H + W * crop_size) * mxu_bytes
    )
    cost = pl.CostEstimate(flops=flops, transcendentals=0,
                           bytes_accessed=bytes_accessed)

    # VMEM footprint: double-buffered image/output blocks, single-buffered
    # resize matrices, step-1 intermediate, in-kernel cast copy, plus slack.
    vmem_bytes = (
        2 * C * H * W * img.dtype.itemsize
        + 2 * C * crop_size * crop_size * 4
        + (crop_size * H + W * crop_size) * mxu_bytes
        + C * H * crop_size * (4 + mxu_bytes)
        + C * H * W * mxu_bytes
        + (2 << 20)
    )
    vmem_limit = min(max(int(vmem_bytes * 1.25), 16 << 20), _vmem_ceiling_bytes())

    return pl.pallas_call(
        _make_preprocess_kernel(mxu_dtype),
        out_shape=jax.ShapeDtypeStruct((B, C, crop_size, crop_size), jnp.float32),
        grid_spec=grid_spec,
        compiler_params=pltpu.CompilerParams(
            dimension_semantics=("parallel",),
            vmem_limit_bytes=vmem_limit,
        ),
        cost_estimate=cost,
    )(scale_arr, bias_arr, Rh, RwT, img)


# ---------------------------------------------------------------------------
# Pure NumPy (float64) reference with identical resize/crop/normalize math.
# ---------------------------------------------------------------------------
def _reference(img, *, crop_size, resize_size, mean, std):
    x = np.asarray(img, dtype=np.float64)
    B, C, H, W = x.shape
    top = _center_crop_offset(resize_size, crop_size)
    Rh = _bilinear_resize_matrix(H, resize_size)[top:top + crop_size, :]
    Rw = _bilinear_resize_matrix(W, resize_size)[top:top + crop_size, :]
    res = np.einsum("oh,bchw,pw->bcop", Rh, x, Rw)
    m = np.asarray(mean, np.float64)[None, :, None, None]
    s = np.asarray(std, np.float64)[None, :, None, None]
    return (res - m) / s


if __name__ == "__main__":
    key = jax.random.PRNGKey(0)
    B, C, H, W = 2, 3, 32, 32
    resize_size, crop_size = 24, 16
    mean = (0.485, 0.456, 0.406)
    std = (0.229, 0.224, 0.225)

    img_f = jax.random.uniform(key, (B, C, H, W), dtype=jnp.float32)
    ref_f = _reference(np.asarray(img_f), crop_size=crop_size,
                       resize_size=resize_size, mean=mean, std=std)

    # --- float input, bf16-MXU path (default, fast).  bf16 inputs give ~1e-3
    #     relative error on the resized value -> a few 1e-2 absolute after /std.
    out_f = image_classification_preprocess(
        img_f, crop_size=crop_size, resize_size=resize_size, mean=mean, std=std)
    out_f = jax.block_until_ready(out_f)
    assert out_f.shape == (B, C, crop_size, crop_size)
    np.testing.assert_allclose(np.asarray(out_f), ref_f, rtol=5e-2, atol=6e-2)

    # --- uint8 input: convert_image_dtype's 1/255 is folded into Rh (uint8
    #     values 0..255 are exact in bf16).
    img_u8 = (img_f * 255.0).astype(jnp.uint8)
    ref_u8 = _reference(np.asarray(img_u8).astype(np.float64) / 255.0,
                        crop_size=crop_size, resize_size=resize_size,
                        mean=mean, std=std)
    out_u8 = image_classification_preprocess(
        img_u8, crop_size=crop_size, resize_size=resize_size, mean=mean, std=std)
    out_u8 = jax.block_until_ready(out_u8)
    assert out_u8.shape == (B, C, crop_size, crop_size)
    np.testing.assert_allclose(np.asarray(out_u8), ref_u8, rtol=5e-2, atol=6e-2)

    print("KERNEL_OK")
</pallas_src>

<mosaic_0001>
module attributes {stable_mosaic.version = 11 : i64} {
  func.func @kernel(%arg0: i32, %arg1: memref<3xf32, #tpu.memory_space<smem>>, %arg2: memref<3xf32, #tpu.memory_space<smem>>, %arg3: memref<16x32xbf16, #tpu.memory_space<vmem>>, %arg4: memref<32x16xbf16, #tpu.memory_space<vmem>>, %arg5: memref<1x3x32x32xf32, #tpu.memory_space<vmem>>, %arg6: memref<1x3x16x16xf32, #tpu.memory_space<vmem>>) attributes {dimension_semantics = [#tpu.dimension_semantics<parallel>], iteration_bounds = array<i64: 2>, scalar_prefetch = 2 : i64, scratch_operands = 0 : i64, tpu.core_type = #tpu.core_type<tc>, window_params = [{pipeline_mode = #tpu.pipeline_mode<synchronous>, transform_indices = @transform_0, window_bounds = array<i64: 16, 32>}, {pipeline_mode = #tpu.pipeline_mode<synchronous>, transform_indices = @transform_1, window_bounds = array<i64: 32, 16>}, {transform_indices = @transform_2, window_bounds = array<i64: 1, 3, 32, 32>}, {transform_indices = @transform_3, window_bounds = array<i64: 1, 3, 16, 16>}]} {
    %c0 = arith.constant 0 : index
    %c0_0 = arith.constant 0 : index
    %c0_1 = arith.constant 0 : index
    %c0_2 = arith.constant 0 : index
    %0 = vector.load %arg5[%c0, %c0_0, %c0_1, %c0_2] : memref<1x3x32x32xf32, #tpu.memory_space<vmem>>, vector<1x3x32x32xf32>
    %1 = vector.shape_cast %0 : vector<1x3x32x32xf32> to vector<3x32x32xf32>
    %2 = arith.truncf %1 : vector<3x32x32xf32> to vector<3x32x32xbf16>
    %3 = vector.shape_cast %2 : vector<3x32x32xbf16> to vector<96x32xbf16>
    %c0_3 = arith.constant 0 : index
    %c0_4 = arith.constant 0 : index
    %4 = vector.load %arg4[%c0_3, %c0_4] : memref<32x16xbf16, #tpu.memory_space<vmem>>, vector<32x16xbf16>
    %cst = arith.constant dense<0.000000e+00> : vector<96x16xf32>
    %5 = tpu.matmul %3, %4, %cst {dimension_numbers = #tpu.dot_dimension_numbers<[1], [0], [0], [1], [0, 0, 1, 1], [], []>} : vector<96x32xbf16>, vector<32x16xbf16>, vector<96x16xf32> -> vector<96x16xf32>
    %6 = arith.truncf %5 : vector<96x16xf32> to vector<96x16xbf16>
    %c0_5 = arith.constant 0 : index
    %c0_6 = arith.constant 0 : index
    %7 = vector.load %arg3[%c0_5, %c0_6] : memref<16x32xbf16, #tpu.memory_space<vmem>>, vector<16x32xbf16>
    %8 = vector.extract_strided_slice %6 {offsets = [0, 0], sizes = [32, 16], strides = [1, 1]} : vector<96x16xbf16> to vector<32x16xbf16>
    %cst_7 = arith.constant dense<0.000000e+00> : vector<16x16xf32>
    %9 = tpu.matmul %7, %8, %cst_7 {dimension_numbers = #tpu.dot_dimension_numbers<[1], [0], [0], [1], [0, 0, 1, 1], [], []>} : vector<16x32xbf16>, vector<32x16xbf16>, vector<16x16xf32> -> vector<16x16xf32>
    %c0_8 = arith.constant 0 : index
    %10 = memref.load %arg1[%c0_8] : memref<3xf32, #tpu.memory_space<smem>>
    %11 = vector.broadcast %10 : f32 to vector<16x16xf32>
    %12 = arith.mulf %9, %11 : vector<16x16xf32>
    %c0_9 = arith.constant 0 : index
    %13 = memref.load %arg2[%c0_9] : memref<3xf32, #tpu.memory_space<smem>>
    %14 = vector.broadcast %13 : f32 to vector<16x16xf32>
    %15 = arith.addf %12, %14 : vector<16x16xf32>
    %c0_10 = arith.constant 0 : index
    %c0_11 = arith.constant 0 : index
    %c0_12 = arith.constant 0 : index
    %c0_13 = arith.constant 0 : index
    %16 = vector.load %arg6[%c0_10, %c0_11, %c0_12, %c0_13] : memref<1x3x16x16xf32, #tpu.memory_space<vmem>>, vector<1x1x16x16xf32>
    %17 = vector.shape_cast %16 : vector<1x1x16x16xf32> to vector<16x16xf32>
    %18 = vector.shape_cast %15 : vector<16x16xf32> to vector<1x1x16x16xf32>
    tpu.vector_store %arg6[%c0_10, %c0_11, %c0_12, %c0_13], %18 {strides = array<i32>} : memref<1x3x16x16xf32, #tpu.memory_space<vmem>>, vector<1x1x16x16xf32>,
    %19 = vector.extract_strided_slice %6 {offsets = [32, 0], sizes = [32, 16], strides = [1, 1]} : vector<96x16xbf16> to vector<32x16xbf16>
    %cst_14 = arith.constant dense<0.000000e+00> : vector<16x16xf32>
    %20 = tpu.matmul %7, %19, %cst_14 {dimension_numbers = #tpu.dot_dimension_numbers<[1], [0], [0], [1], [0, 0, 1, 1], [], []>} : vector<16x32xbf16>, vector<32x16xbf16>, vector<16x16xf32> -> vector<16x16xf32>
    %c1 = arith.constant 1 : index
    %21 = memref.load %arg1[%c1] : memref<3xf32, #tpu.memory_space<smem>>
    %22 = vector.broadcast %21 : f32 to vector<16x16xf32>
    %23 = arith.mulf %20, %22 : vector<16x16xf32>
    %c1_15 = arith.constant 1 : index
    %24 = memref.load %arg2[%c1_15] : memref<3xf32, #tpu.memory_space<smem>>
    %25 = vector.broadcast %24 : f32 to vector<16x16xf32>
    %26 = arith.addf %23, %25 : vector<16x16xf32>
    %c0_16 = arith.constant 0 : index
    %c1_17 = arith.constant 1 : index
    %c0_18 = arith.constant 0 : index
    %c0_19 = arith.constant 0 : index
    %27 = vector.load %arg6[%c0_16, %c1_17, %c0_18, %c0_19] : memref<1x3x16x16xf32, #tpu.memory_space<vmem>>, vector<1x1x16x16xf32>
    %28 = vector.shape_cast %27 : vector<1x1x16x16xf32> to vector<16x16xf32>
    %29 = vector.shape_cast %26 : vector<16x16xf32> to vector<1x1x16x16xf32>
    tpu.vector_store %arg6[%c0_16, %c1_17, %c0_18, %c0_19], %29 {strides = array<i32>} : memref<1x3x16x16xf32, #tpu.memory_space<vmem>>, vector<1x1x16x16xf32>,
    %30 = vector.extract_strided_slice %6 {offsets = [64, 0], sizes = [32, 16], strides = [1, 1]} : vector<96x16xbf16> to vector<32x16xbf16>
    %cst_20 = arith.constant dense<0.000000e+00> : vector<16x16xf32>
    %31 = tpu.matmul %7, %30, %cst_20 {dimension_numbers = #tpu.dot_dimension_numbers<[1], [0], [0], [1], [0, 0, 1, 1], [], []>} : vector<16x32xbf16>, vector<32x16xbf16>, vector<16x16xf32> -> vector<16x16xf32>
    %c2 = arith.constant 2 : index
    %32 = memref.load %arg1[%c2] : memref<3xf32, #tpu.memory_space<smem>>
    %33 = vector.broadcast %32 : f32 to vector<16x16xf32>
    %34 = arith.mulf %31, %33 : vector<16x16xf32>
    %c2_21 = arith.constant 2 : index
    %35 = memref.load %arg2[%c2_21] : memref<3xf32, #tpu.memory_space<smem>>
    %36 = vector.broadcast %35 : f32 to vector<16x16xf32>
    %37 = arith.addf %34, %36 : vector<16x16xf32>
    %c0_22 = arith.constant 0 : index
    %c2_23 = arith.constant 2 : index
    %c0_24 = arith.constant 0 : index
    %c0_25 = arith.constant 0 : index
    %38 = vector.load %arg6[%c0_22, %c2_23, %c0_24, %c0_25] : memref<1x3x16x16xf32, #tpu.memory_space<vmem>>, vector<1x1x16x16xf32>
    %39 = vector.shape_cast %38 : vector<1x1x16x16xf32> to vector<16x16xf32>
    %40 = vector.shape_cast %37 : vector<16x16xf32> to vector<1x1x16x16xf32>
    tpu.vector_store %arg6[%c0_22, %c2_23, %c0_24, %c0_25], %40 {strides = array<i32>} : memref<1x3x16x16xf32, #tpu.memory_space<vmem>>, vector<1x1x16x16xf32>,
    return
  }
  func.func @transform_0(%arg0: i32, %arg1: memref<3xf32, #tpu.memory_space<smem>>, %arg2: memref<3xf32, #tpu.memory_space<smem>>) -> (i32, i32) {
    %c0_i32 = arith.constant 0 : i32
    %c0_i32_0 = arith.constant 0 : i32
    %c0_i32_1 = arith.constant 0 : i32
    return %c0_i32, %c0_i32_0 : i32, i32
  }
  func.func @transform_1(%arg0: i32, %arg1: memref<3xf32, #tpu.memory_space<smem>>, %arg2: memref<3xf32, #tpu.memory_space<smem>>) -> (i32, i32) {
    %c0_i32 = arith.constant 0 : i32
    %c0_i32_0 = arith.constant 0 : i32
    %c0_i32_1 = arith.constant 0 : i32
    return %c0_i32, %c0_i32_0 : i32, i32
  }
  func.func @transform_2(%arg0: i32, %arg1: memref<3xf32, #tpu.memory_space<smem>>, %arg2: memref<3xf32, #tpu.memory_space<smem>>) -> (i32, i32, i32, i32) {
    %c0_i32 = arith.constant 0 : i32
    %c0_i32_0 = arith.constant 0 : i32
    %c0_i32_1 = arith.constant 0 : i32
    %c0_i32_2 = arith.constant 0 : i32
    return %arg0, %c0_i32, %c0_i32_0, %c0_i32_1 : i32, i32, i32, i32
  }
  func.func @transform_3(%arg0: i32, %arg1: memref<3xf32, #tpu.memory_space<smem>>, %arg2: memref<3xf32, #tpu.memory_space<smem>>) -> (i32, i32, i32, i32) {
    %c0_i32 = arith.constant 0 : i32
    %c0_i32_0 = arith.constant 0 : i32
    %c0_i32_1 = arith.constant 0 : i32
    %c0_i32_2 = arith.constant 0 : i32
    return %arg0, %c0_i32, %c0_i32_0, %c0_i32_1 : i32, i32, i32, i32
  }
}

</mosaic_0001>

<bundles_post_ra>
// kernel: tpu_custom_call.1
= control target key start
LH: loop header
LB: loop body
LE: loop exit
PB: predicated region body
PF: predicated region fallthrough
CT: control target
= control target key end

     0   :  { %s782_s24 = smov [#allocation3]   ;;  %s783_s25 = smov [#allocation4]   ;;  %s989_s0 = inlined_call_operand.vmem [shape: f32[3], index: 0, kind: input, shape index: {}]   ;;  %s990_s2 = inlined_call_operand.vmem [shape: bf16[16,32], index: 2, kind: input, shape index: {}]   ;;  %s991_s3 = inlined_call_operand.vmem [shape: bf16[32,16], index: 3, kind: input, shape index: {}]   ;;  %s992_s4 = inlined_call_operand.hbm [shape: f32[2,3,32,32], index: 4, kind: input, shape index: {}]   ;;  %s993_s5 = inlined_call_operand.hbm [shape: f32[2,3,16,16], index: 5, kind: output, shape index: {}]   ;;  %s994_s1 = inlined_call_operand.vmem [shape: f32[3], index: 1, kind: input, shape index: {}]  }
   0x1   :  { %s11_s20 = sshll.u32 %s989_s0, 4  ;;  %s16_s23 = sshll.u32 %s994_s1, 4  ;;  %s12_s20 = int_to_ptr.vmem [resolvable:$true] %s11_s20  ;;  %s17_s23 = int_to_ptr.vmem [resolvable:$true] %s16_s23 }
   0x2   :  { %14 = dma.vmem_to_smem %s12_s20, 16, %s782_s24, [#allocation2] }
   0x3   :  { %19 = dma.vmem_to_smem %s17_s23, 16, %s783_s25, [#allocation2] }
   0x4   :  { %756 = dma.done.wait [#allocation2], 32 }
   0x5   :  { %757 = vsyncadd [#allocation2], 4294967264 }
   0x6   :  { %22 = sfence }
   0x7   :  { %23 = vsyncpa [#allocation6], 0 }
   0x8   :  { %25 = vsyncpa [#allocation6 + $0x1], 0 }
   0x9   :  { %26 = vsyncpa [#allocation7], 0 }
   0xa   :  { %28 = vsyncpa [#allocation7 + $0x1], 0  ;;  %s824_s26 = smov 0   ;;  %s826_s0 = smov 0  }
   0xb   :  { %s828_s27 = smov 0   ;;  %s830_s1 = smov 0  }
   0xc LB: > { %s845_s28 = sadd.s32 4294967295, %s780_s1   ;;  %s557_s29 = sadd.s32 4294967294, %s780_s1   ;;  %s780_s1 = sphi %s830_s1, %s1002_s1   ;;  %s776_s27 = sphi %s828_s27, %s1001_s27   ;;  %s772_s0 = sphi %s826_s0, %s1000_s0   ;;  %s768_s26 = sphi %s824_s26, %s999_s26  }
   0xd   : > { %s849_s30 = sadd.s32 1, %s780_s1   ;;  %s83_s6 = sadd.s32 1, %s776_s27 }
   0xe   : > { %s80_s7 = ssub.s32 %s780_s1, %s849_s30  ;;  %p90_p0 = scmp.ne.s32.totalorder %s776_s27, %s772_s0 }
   0xf   : > { %p81_p1 = scmp.eq.s32.totalorder %s80_s7, 0  ;;  %p91_p2 = scmp.eq.s32.totalorder %s780_s1, 0 }
  0x10   : > { %p96_p3 = scmp.ne.s32.totalorder %s772_s0, %s768_s26  ;;  %p97_p4 = scmp.eq.s32.totalorder %s845_s28, 0 }
  0x11   : > { %s861_s8 = scalar_select %p81_p1, %s776_s27, %s83_s6  }
  0x12   : > { %p92_p5 = por %p91_p2, %p90_p0  ;;  %p863_p6 = por %p97_p4, %p96_p3 }
  0x13   : > { %p120_p7 = scmp.eq.s32.totalorder %s845_s28, 1  ;;  %p126_p8 = scmp.eq.s32.totalorder %s557_s29, 1 }
  0x14   : > { %p559_p9 = scmp.ge.s32.totalorder %s780_s1, 2  ;;  %p618_p10 = scmp.lt.s32.totalorder %s780_s1, 2 }
  0x15   : > { %p870_p11 = por %p120_p7, %p90_p0  ;;  %p874_p12 = por %p126_p8, %p96_p3 }
  0x16   : > { %s152_s12 = sand.u32 1, %s776_s27   ;;  %s602_s13 = smul.u32 96, %s780_s1 }
  0x17   : > { %s601_s14 = smul.u32 96, %s152_s12  ;;  %p883_p13 = pnand %p618_p10, %p92_p5 }
  0x18   : > { %s161_s17 = scalar_lea.hbm %s992_s4, %s602_s13  ;;  %s153_s22 = scalar_lea.sflag [#allocation6], %s152_s12 }
  0x19   : > { %s162_s19 = sshll.u32 %s161_s17, 4  ;;  %s156_s20 = scalar_lea.vmem [#allocation5], %s601_s14  ;;  %s163_s19 = int_to_ptr.hbm [resolvable:$true] %s162_s19 }
  0x1a   : > { %s164_s21 = sshll.u32 %s156_s20, 4  ;;  %s682_s23 = sshra.s32 %s163_s19, 4  ;;  %s165_s21 = int_to_ptr.vmem [resolvable:$true] %s164_s21  ;;  %s683_s23 = int_to_ptr.hbm [resolvable:$true] %s682_s23 }
  0x1b   : > { %s684_s24 = scalar_lea.hbm %s683_s23, 96  ;;  %p686_p1 = pneg %p883_p13 }
  0x1c   : > { %p685_p0 = scmp.ne.s32.totalorder %s683_s23, %s684_s24  ;;  %s689_s6 = scalar_lea.hbm %s992_s4, 192 }
  0x1d   : > { %p690_p4 = scmp.lt.s32.totalorder %s683_s23, %s992_s4  ;;  %p691_p5 = scmp.lt.s32.totalorder %s689_s6, %s684_s24 }
  0x1e   : > { %p687_p2 = pnand %p686_p1, %p685_p0 }
  0x1f   : > { %p692_p7 = por %p691_p5, %p690_p4 }
  0x20   : > { %p688_p3 = pneg %p687_p2 }
  0x22   : > { %p693_p8 = pnand %p692_p7, %p688_p3 }
  0x24   : > { %696 = shalt.err (!%p693_p8)
}
  0x25   : > { %s784_s12 = smov 128   ;;  %s785_s14 = smov 8  }
  0x26   : > { %613 = dma.hbm_to_vmem [thread:$0]  (!%p883_p13), %s163_s19, 1536, %s165_s21, %s153_s22, %s784_s12, %s784_s12, %s785_s14  }
  0x27   : > { %p561_p10 = scmp.ge.s32.totalorder %s780_s1, 1  ;;  %p172_p0 = scmp.lt.s32.totalorder %s780_s1, 3 }
  0x29   : > { %p173_p1 = pnand %p561_p10, %p172_p0 }
  0x2a   : > { %s900_s15 = sand.u32 (!%p173_p1), 1, %s772_s0  }
  0x2b   : > { %176 = sbr.rel (%p173_p1) target bundleno = 380 (0x17c), region = 32  ;;  %s179_s17 = scalar_lea.sflag (!%p173_p1), [#allocation6], %s900_s15 }
  0x2c   : > { %s603_s16 = smul.u32 (!%p173_p1), 96, %s900_s15 }
  0x2e   : > { %s904_s20 = scalar_lea.vmem (!%p173_p1), [#allocation5], %s603_s16 }
  0x30   : > { %759 = dma.done.wait (%p863_p6), %s179_s17, 1536  }
  0x31   : > { %761 = vsyncadd (%p863_p6), %s179_s17, 4294965760  ;;  %v595_v0 = vld [vmem:[%s991_s3 + $0x8] sm:$0xff]  ;;  %v207_v1 = vld [vmem:[%s904_s20] sm:$0xff]  ;;  %vm277_vm0 = vcmask 261120   ;;  %s383_s24 = sld [smem:[#allocation3]]  ;;  %s604_s29 = smul.u32 48, %s900_s15 }
  0x32   : > { %v208_v2 = vld [vmem:[%s904_s20 + $0x8] sm:$0xff]  ;;  %v219_v3 = vpack.c.bf16 %v207_v1, %v207_v1  ;;  %v215_v4 = vld [vmem:[%s904_s20 + $0x40] sm:$0xff]  ;;  %302 = vmatpush.bf16.msra.mxu0 %v595_v0  ;;  %598 = vmatpush.bf16.msra.mxu2 %v595_v0  ;;  %v213_v10 = vld [vmem:[%s904_s20 + $0x30] sm:$0xff]  ;;  %s387_s25 = sld [smem:[#allocation4]]  ;;  %vm391_vm1 = vcmask 130048   ;;  %s605_s16 = smul.u32 48, %s845_s28 }
  0x33   : > { %v216_v5 = vld [vmem:[%s904_s20 + $0x48] sm:$0xff]  ;;  %v594_v6 = vld [vmem:[%s991_s3] sm:$0xff]  ;;  %v220_v7 = vpack.c.bf16 %v208_v2, %v208_v2  ;;  %v227_v8 = vpack.c.bf16 %v215_v4, %v215_v4  ;;  %v214_v11 = vld [vmem:[%s904_s20 + $0x38] sm:$0xff]  ;;  %597 = vmatpush.bf16.msra.mxu1 %v595_v0  ;;  %v225_v13 = vpack.c.bf16 %v213_v10, %v213_v10  ;;  %s587_s6 = sld [smem:[#allocation3 + $0x2]]  ;;  %s941_s13 = scalar_lea.vmem [#allocation8], %s604_s29 }
  0x34   : > { %v228_v9 = vpack.c.bf16 %v216_v5, %v216_v5  ;;  %v247_v12 = vunpack.c.l.b16 %v219_v3  ;;  %v226_v14 = vpack.c.bf16 %v214_v11, %v214_v11  ;;  %v209_v23 = vld [vmem:[%s904_s20 + $0x10] sm:$0xff]  ;;  %v210_v24 = vld [vmem:[%s904_s20 + $0x18] sm:$0xff]  ;;  %v211_v37 = vld [vmem:[%s904_s20 + $0x20] sm:$0xff]  ;;  %s588_s7 = sld [smem:[#allocation4 + $0x2]]  ;;  %s480_s18 = scalar_lea.hbm %s993_s5, %s605_s16 }
  0x35   : > { %v248_v15 = vunpack.c.l.b16 %v220_v7  ;;  %v255_v16 = vunpack.c.l.b16 %v227_v8  ;;  %v253_v18 = vunpack.c.l.b16 %v225_v13  ;;  %v217_v25 = vld [vmem:[%s904_s20 + $0x50] sm:$0xff]  ;;  %v218_v26 = vld [vmem:[%s904_s20 + $0x58] sm:$0xff]  ;;  %v221_v27 = vpack.c.bf16 %v209_v23, %v209_v23  ;;  %v212_v38 = vld [vmem:[%s904_s20 + $0x28] sm:$0xff]  ;;  %s582_s12 = sld [smem:[#allocation3 + $0x1]]  ;;  %s481_s19 = sshll.u32 %s941_s13, 4  ;;  %s482_s19 = int_to_ptr.vmem [resolvable:$true] %s481_s19 }
  0x36   : > { %v256_v17 = vunpack.c.l.b16 %v228_v9  ;;  %v254_v19 = vunpack.c.l.b16 %v226_v14  ;;  %303 = vmatpush.bf16.msra.mxu0 %v594_v6  ;;  %600 = vmatpush.bf16.msra.mxu2 %v594_v6  ;;  %v222_v28 = vpack.c.bf16 %v210_v24, %v210_v24  ;;  %v229_v29 = vpack.c.bf16 %v217_v25, %v217_v25  ;;  %v596_v14 = vld [vmem:[%s990_s2] sm:$0xff]  ;;  %s583_s14 = sld [smem:[#allocation4 + $0x1]]  ;;  %s483_s21 = sshll.u32 %s480_s18, 4  ;;  %s484_s21 = int_to_ptr.hbm [resolvable:$true] %s483_s21 }
  0x37   : > { %v259_v20 = vpack.c.b16 %v248_v15, %v247_v12  ;;  %599 = vmatpush.bf16.msra.mxu1 %v594_v6  ;;  %v230_v30 = vpack.c.bf16 %v218_v26, %v218_v26  ;;  %v249_v31 = vunpack.c.l.b16 %v221_v27  ;;  %v223_v39 = vpack.c.bf16 %v211_v37, %v211_v37  ;;  %s469_s28 = scalar_lea.sflag [#allocation7], %s900_s15  ;;  %s726_s9 = sshra.s32 %s484_s21, 4  ;;  %s727_s9 = int_to_ptr.hbm [resolvable:$true] %s726_s9 }
  0x38   : > { %v263_v21 = vpack.c.b16 %v256_v17, %v255_v16  ;;  %v262_v22 = vpack.c.b16 %v254_v19, %v253_v18  ;;  %v250_v32 = vunpack.c.l.b16 %v222_v28  ;;  %v257_v33 = vunpack.c.l.b16 %v229_v29  ;;  %s728_s22 = scalar_lea.hbm %s727_s9, 48  ;;  %p733_p3 = scmp.lt.s32.totalorder %s727_s9, %s993_s5 }
  0x39   : > { %570 = vmatmul.msk.bf16.vlgmr.msra.gmra.mxu0 %vm277_vm0, %v259_v20  ;;  %v258_v34 = vunpack.c.l.b16 %v230_v30  ;;  %v224_v40 = vpack.c.bf16 %v212_v38, %v212_v38  ;;  %v251_v41 = vunpack.c.l.b16 %v223_v39  ;;  %v384_v23 = vstv %s383_s24  ;;  %p729_p6 = scmp.ne.s32.totalorder %s727_s9, %s728_s22 }
  0x3a   : > { %574 = vmatmul.msk.bf16.vlgmr.msra.gmra.mxu2 %vm277_vm0, %v263_v21  ;;  %573 = vmatmul.msk.bf16.vlgmr.msra.gmra.mxu1 %vm277_vm0, %v262_v22  ;;  %v260_v35 = vpack.c.b16 %v250_v32, %v249_v31  ;;  %v388_v25 = vstv %s387_s25  ;;  %v458_v30 = vstv %s587_s6  ;;  %s732_s25 = scalar_lea.hbm %s993_s5, 96 }
  0x3b   : > { %v264_v36 = vpack.c.b16 %v258_v34, %v257_v33  ;;  %v252_v42 = vunpack.c.l.b16 %v224_v40  ;;  %v462_v33 = vstv %s588_s7  ;;  %p730_p13 = pnand %p729_p6, %p870_p11  ;;  %p734_p4 = scmp.lt.s32.totalorder %s732_s25, %s728_s22 }
  0x3c   : > { %v425_v38 = vstv %s583_s14 }
  0x3d   : > { %v261_v43 = vpack.c.b16 %v252_v42, %v251_v41  ;;  %p731_p2 = pneg %p730_p13  ;;  %p735_p5 = por %p734_p4, %p733_p3 }
  0x3f   : > { %p736_p7 = pnand %p735_p5, %p731_p2 }
  0x49   : > { %571 = vmatmul.msk.bf16.gmra.mxu0 %vm277_vm0, %v260_v35 }
  0x4a   : > { %575 = vmatmul.msk.bf16.gmra.mxu2 %vm277_vm0, %v264_v36  ;;  %v421_v36 = vstv %s582_s12 }
  0x59   : > { %572 = vmatmul.msk.bf16.gmra.mxu0 %vm277_vm0, %v261_v43 }
  0xb6   : > { %v305_v44 = vpop.f32.mrf.mxu0 }
  0xb7   : > { %v320_v45 = vpop.f32.mrf.mxu1  ;;  %v335_v61 = vpack.c.bf16 %v305_v44, %v305_v44 }
  0xb8   : > { %v341_v47 = vpack.c.bf16 %v320_v45, %v320_v45 }
  0xb9   : > { %v358_v4 = vunpack.c.l.b16 %v335_v61 }
  0xba   : > { %v400_v50 = vunpack.c.l.b16 %v341_v47 }
  0xbd   : > { %v325_v46 = vpop.f32.mrf.mxu2 }
  0xbe   : > { %v307_v48 = vpop.f32.mrf.mxu0  ;;  %v343_v8 = vpack.c.bf16 %v325_v46, %v325_v46 }
  0xbf   : > { %v322_v49 = vpop.f32.mrf.mxu1  ;;  %v336_v59 = vpack.c.bf16 %v307_v48, %v307_v48 }
  0xc0   : > { %v342_v51 = vpack.c.bf16 %v322_v49, %v322_v49  ;;  %v435_v15 = vunpack.c.l.b16 %v343_v8 }
  0xc1   : > { %v359_v0 = vunpack.c.l.b16 %v336_v59 }
  0xc2   : > { %v401_v52 = vunpack.c.l.b16 %v342_v51 }
  0xc3   : > { %v362_v11 = vpack.c.b16 %v359_v0, %v358_v4 }
  0xc4   : > { %v403_v54 = vpack.c.b16 %v401_v52, %v400_v50 }
  0xc5   : > { %v327_v53 = vpop.f32.mrf.mxu2 }
  0xc6   : > { %v310_v55 = vpop.f32.mrf.mxu0  ;;  %412 = vmatpush.bf16.msrb.mxu2 %v403_v54  ;;  %v344_v5 = vpack.c.bf16 %v327_v53, %v327_v53 }
  0xc7   : > { %v337_v57 = vpack.c.bf16 %v310_v55, %v310_v55 }
  0xc8   : > { %v436_v12 = vunpack.c.l.b16 %v344_v5 }
  0xc9   : > { %v360_v62 = vunpack.c.l.b16 %v337_v57 }
  0xca   : > { %v439_v17 = vpack.c.b16 %v436_v12, %v435_v15 }
  0xcd   : > { %v330_v56 = vpop.f32.mrf.mxu2 }
  0xce   : > { %v312_v58 = vpop.f32.mrf.mxu0  ;;  %v345_v1 = vpack.c.bf16 %v330_v56, %v330_v56 }
  0xcf   : > { %v338_v60 = vpack.c.bf16 %v312_v58, %v312_v58 }
  0xd0   : > { %v437_v9 = vunpack.c.l.b16 %v345_v1 }
  0xd1   : > { %v361_v63 = vunpack.c.l.b16 %v338_v60 }
  0xd3   : > { %v363_v2 = vpack.c.b16 %v361_v63, %v360_v62 }
  0xd5   : > { %v332_v3 = vpop.f32.mrf.mxu2  ;;  %375 = vmatpush.bf16.msrb.mxu1 %v363_v2 }
  0xd6   : > { %v346_v6 = vpack.c.bf16 %v332_v3, %v332_v3  ;;  %v315_v7 = vpop.f32.mrf.mxu0 }
  0xd7   : > { %v339_v16 = vpack.c.bf16 %v315_v7, %v315_v7 }
  0xd8   : > { %v438_v10 = vunpack.c.l.b16 %v346_v6 }
  0xd9   : > { %376 = vmatpush.bf16.msrb.mxu1 %v362_v11  ;;  %v398_v20 = vunpack.c.l.b16 %v339_v16 }
  0xda   : > { %v440_v13 = vpack.c.b16 %v438_v10, %v437_v9 }
  0xdc   : > { %449 = vmatpush.bf16.msra.mxu3 %v440_v13  ;;  %580 = vmatmul.msk.bf16.vlgmr.msrb.gmra.mxu1 %vm277_vm0, %v596_v14 }
  0xde   : > { %v317_v18 = vpop.f32.mrf.mxu0 }
  0xdf   : > { %v340_v19 = vpack.c.bf16 %v317_v18, %v317_v18 }
  0xe0   : > { %450 = vmatpush.bf16.msra.mxu3 %v439_v17 }
  0xe1   : > { %v399_v21 = vunpack.c.l.b16 %v340_v19 }
  0xe3   : > { %586 = vmatmul.msk.bf16.vlgmr.msra.gmra.mxu3 %vm277_vm0, %v596_v14  ;;  %v402_v22 = vpack.c.b16 %v399_v21, %v398_v20 }
  0xe5   : > { %413 = vmatpush.bf16.msrb.mxu2 %v402_v22 }
  0xe8   : > { %581 = vmatmul.msk.bf16.vlgmr.msrb.gmra.mxu2 %vm277_vm0, %v596_v14 }
 0x159   : > { %v378_v24 = vpop.f32.mrf.mxu1 }
 0x15a   : > { %v385_v26 = vmul.f32 %v384_v23, %v378_v24 }
 0x15c   : > { %v389_v27 = vadd.f32 %v388_v25, %v385_v26 }
 0x15e   : > { %392 = vst.msk [vmem:[%s941_s13] sm:$0xff] %vm391_vm1, %v389_v27 }
 0x161   : > { %v380_v28 = vpop.f32.mrf.mxu1 }
 0x162   : > { %v386_v29 = vmul.f32 %v384_v23, %v380_v28 }
 0x164   : > { %v390_v31 = vadd.f32 %v388_v25, %v386_v29 }
 0x166   : > { %v452_v32 = vpop.f32.mrf.mxu3  ;;  %393 = vst.msk [vmem:[%s941_s13 + $0x8] sm:$0xff] %vm391_vm1, %v390_v31 }
 0x167   : > { %v459_v34 = vmul.f32 %v458_v30, %v452_v32 }
 0x169   : > { %v463_v35 = vadd.f32 %v462_v33, %v459_v34 }
 0x16b   : > { %589 = vst.msk [vmem:[%s941_s13 + $0x20] sm:$0xff] %vm391_vm1, %v463_v35  ;;  %v415_v37 = vpop.f32.mrf.mxu2 }
 0x16c   : > { %v422_v39 = vmul.f32 %v421_v36, %v415_v37 }
 0x16e   : > { %v454_v40 = vpop.f32.mrf.mxu3  ;;  %v426_v41 = vadd.f32 %v425_v38, %v422_v39 }
 0x16f   : > { %v460_v42 = vmul.f32 %v458_v30, %v454_v40 }
 0x170   : > { %584 = vst.msk [vmem:[%s941_s13 + $0x10] sm:$0xff] %vm391_vm1, %v426_v41 }
 0x171   : > { %v464_v43 = vadd.f32 %v462_v33, %v460_v42 }
 0x173   : > { %590 = vst.msk [vmem:[%s941_s13 + $0x28] sm:$0xff] %vm391_vm1, %v464_v43  ;;  %v417_v44 = vpop.f32.mrf.mxu2 }
 0x174   : > { %v423_v45 = vmul.f32 %v421_v36, %v417_v44 }
 0x176   : > { %v427_v46 = vadd.f32 %v425_v38, %v423_v45 }
 0x178   : > { %585 = vst.msk [vmem:[%s941_s13 + $0x18] sm:$0xff] %vm391_vm1, %v427_v46 }
 0x179   : > { %739 = shalt.err (!%p736_p7)
}
 0x17a   : > { %s786_s15 = smov 128   ;;  %s787_s7 = smov 8  }
 0x17b   : > { %608 = dma.vmem_to_hbm [thread:$0]  (%p870_p11), %s482_s19, 768, %s484_s21, %s469_s28, %s786_s15, %s786_s15, %s787_s7  }
 0x17c PF: > { %s498_s13 = sand.u32 1, %s768_s26   ;;  %p615_p8 = pnand %p559_p9, %p874_p12 }
 0x17d   : > { %s499_s12 = scalar_lea.sflag [#allocation7], %s498_s13 }
 0x17e   : > { %p616_p10 = pneg %p615_p8 }
 0x180   : > { %763 = dma.done.wait (%p616_p10), %s499_s12, 768  }
 0x181   : > { %765 = vsyncadd (%p616_p10), %s499_s12, 4294966528  ;;  %p31_p0 = scmp.ge.s32.totalorder %s849_s30, 4   ;;  %s999_s26 = smov %s772_s0 }
 0x182   : > { %s1000_s0 = smov %s776_s27  ;;  %s1001_s27 = smov %s861_s8 }
 0x183   : > { %s1002_s1 = smov %s849_s30  ;;  %33 = sbr.rel (!%p31_p0) target bundleno = 12 (0xc), region = 79 }
 0x188   :  { %505 = vsyncpa [#allocation6], 1 }
 0x189   :  { %507 = vsyncpa [#allocation6 + $0x1], 1 }
 0x18a   :  { %508 = vsyncpa [#allocation7], 1 }
 0x18b   :  { %510 = vsyncpa [#allocation7 + $0x1], 1 }

</bundles_post_ra>
